<compile_context>
chip_gen: v6e
topology: v6e:2x2x1
jax: 0.10.0
libtpu: 0.0.40
codegen_flags: <defaults>
</compile_context>

<pallas_src>
from functools import partial

import jax
import jax.numpy as jnp
from jax import lax
from jax.experimental import pallas as pl
from jax.experimental.pallas import tpu as pltpu

TEMPERATURE = 0.07
SEVERITY_TO_IDX = {'healthy': 0, 'mild': 1, 'moderate': 2, 'severe': 3}
SEVERITY_WEIGHTS = {'mild': 1.0, 'moderate': 1.5, 'severe': 2.0}
_EPS = 1e-8           # F.cosine_similarity default eps (clamps each norm)
_EPS2 = _EPS * _EPS   # rsqrt(max(n^2, eps^2)) == 1 / max(||.||, eps)


# --------------------------------------------------------------------------------------
# Kernel
# --------------------------------------------------------------------------------------
def _contrastive_kernel(*refs, inv_temp, adaptive_margin, has_mask):
    """One grid step processes a (B, tile_t, D) slab of pred/pos/neg.

    Grid = (parallel_chunks, time_tiles).  The inner time axis is a reduction
    ("arbitrary"); the outer axis is "parallel" so each TensorCore (v7x has 2)
    produces an independent partial sum written to its own output block.
    """
    if has_mask:
        margin_ref, mask_ref, pred_ref, pos_ref, neg_ref, out_ref, acc_ref = refs
    else:
        margin_ref, pred_ref, pos_ref, neg_ref, out_ref, acc_ref = refs
        mask_ref = None

    t = pl.program_id(1)

    @pl.when(t == 0)
    def _():
        acc_ref[...] = jnp.zeros_like(acc_ref)

    # Inputs may be bf16 in HBM (halves traffic on this memory-bound kernel);
    # all compute is f32.
    pred = pred_ref[...].astype(jnp.float32)   # (B, tT, D)
    pos = pos_ref[...].astype(jnp.float32)
    neg = neg_ref[...].astype(jnp.float32)

    # sum(pred*pred) computed once and reused by both cosine similarities.
    # rsqrt(max(n^2, eps^2)) == 1/max(||.||, eps): same eps semantics as torch's
    # per-norm clamp, but EUP rsqrt + VPU multiplies instead of sqrt + divide.
    inv_pn = lax.rsqrt(jnp.maximum(jnp.sum(pred * pred, axis=-1), _EPS2))   # (B, tT)

    def _cos(other):
        dot = jnp.sum(pred * other, axis=-1)                                # (B, tT)
        inv_on = lax.rsqrt(jnp.maximum(jnp.sum(other * other, axis=-1), _EPS2))
        return dot * inv_pn * inv_on

    pos_sim = _cos(pos)   # (B, tT)
    neg_sim = _cos(neg)   # (B, tT)

    # Original: loss = -log(exp((p - m)/T) / (exp((p - m)/T) + exp(n/T)))
    #                = log(1 + exp((n - p)/T + m/T))        (softplus of the logit gap)
    # -> one exp + one log per element instead of two exps + divide + log, and no
    #    overflow when pos_sim >> neg_sim.
    z = (neg_sim - pos_sim) * inv_temp
    if adaptive_margin:
        z = z + margin_ref[...]            # (B, 1) = 0.1 * severity / temperature
    loss = jnp.log(1.0 + jnp.exp(z))

    if has_mask:
        loss = loss * mask_ref[...].astype(jnp.float32)

    # Per-step accumulation is a plain VPU add; the scalar reduce and the output
    # store happen only once per parallel chunk (under pl.when below).
    acc_ref[...] += loss

    @pl.when(t == pl.num_programs(1) - 1)
    def _():
        tot = jnp.sum(acc_ref[...], axis=(0, 1), keepdims=True)     # (1, 1)
        out_ref[...] = jnp.broadcast_to(tot[None], out_ref.shape)   # (1, 8, 128) splat


# --------------------------------------------------------------------------------------
# Tiling / VMEM budgeting helpers
# --------------------------------------------------------------------------------------
def _round_up(x, m):
    return ((x + m - 1) // m) * m


def _vmem_limit_bytes():
    """Scoped-VMEM limit: raise above the 16/32 MiB default but keep headroom below
    physical capacity (128 MiB on v5e/v6e, 64 MiB on v7x)."""
    try:
        cap = int(pltpu.get_tpu_info().vmem_capacity_bytes)
    except Exception:
        cap = 64 * 1024 * 1024   # conservative (v7x-sized) fallback
    return min(int(cap * 0.85), cap - (8 << 20))


def _step_vmem_bytes(B, tile_t, D, itemsize, has_mask):
    """Approximate per-step VMEM working set: double-buffered BlockSpec inputs +
    scratch accumulator + output slab, including (8, 128) tile padding."""
    d_pad = _round_up(D, 128)
    t_sub = _round_up(tile_t, 8)
    t_lane = _round_up(tile_t, 128)
    b_sub = _round_up(B, 8)
    units = 3 * 2 * B * t_sub * d_pad * itemsize       # pred/pos/neg, double-buffered
    msk = (2 * b_sub * t_lane * 4) if has_mask else 0  # mask stream (f32), double-buffered
    acc = b_sub * t_lane * 4                           # f32 accumulator scratch
    out = 2 * 8 * 128 * 4
    return units + msk + acc + out


def _choose_tile_t(B, T, D, itemsize, has_mask, vmem_limit):
    """Largest 128-aligned time tile that divides T and fits ~70% of the VMEM limit.
    256-512 rows is the measured HBM-roofline sweet spot, and a multi-step grid is
    required for DMA/compute overlap."""
    budget = int(vmem_limit * 0.7)
    for tt in (512, 384, 256, 128):
        if T % tt == 0 and _step_vmem_bytes(B, tt, D, itemsize, has_mask) <= budget:
            return tt
    # No 128-aligned divisor exists (or fits): fall back to the full time axis.
    # TODO(synk): for long, non-128-aligned T, pad T (with a zero mask) upstream so the
    # streaming path stays pipelined instead of degrading to a single tile.
    return T


# --------------------------------------------------------------------------------------
# Wrapper
# --------------------------------------------------------------------------------------
def severity_contrastive_loss(pred, pos, neg, severity_factors, mask=None, *,
                              temperature=TEMPERATURE, adaptive_margin=True,
                              tile_t=None):
    """pred/pos/neg: (B, T, D) float (f32 or bf16 -- bf16 halves HBM traffic).
    severity_factors: (B,).  mask: (B, T) or None."""
    B, T, D = pred.shape
    has_mask = mask is not None

    vmem_limit = _vmem_limit_bytes()
    itemsize = jnp.dtype(pred.dtype).itemsize
    if tile_t is None:
        tile_t = _choose_tile_t(B, T, D, itemsize, has_mask, vmem_limit)
    assert T % tile_t == 0 and (tile_t == T or tile_t % 128 == 0), (
        "tile_t must divide T and (mask lane layout) be a multiple of 128 or equal T")

    n_tiles = T // tile_t
    # Outer "parallel" axis: lets v7x's two TensorCores each produce an independent
    # partial sum (a single harmless iteration on v5e/v6e).
    n_par = 2 if (n_tiles >= 4 and n_tiles % 2 == 0) else 1
    n_t = n_tiles // n_par

    inv_temp = 1.0 / float(temperature)
    # Margin pre-folded with 1/temperature: softplus argument is (neg-pos)/T + 0.1*sev/T.
    if adaptive_margin:
        margin_pre = (0.1 * inv_temp) * severity_factors.reshape(B, 1).astype(jnp.float32)
    else:
        margin_pre = jnp.zeros((B, 1), jnp.float32)

    # TODO(synk): for D < 128 (lane-padded vregs, 4x VMEM/vreg waste) a (B, D, T) layout
    # with T on lanes would be denser, but needs the upstream producer to emit it — a
    # wrapper transpose would cost a full extra HBM pass on this mem-bound kernel.
    unit_spec = pl.BlockSpec((B, tile_t, D), lambda p, t: (0, p * n_t + t, 0))

    # Margin block index is constant -> Pallas fetches it once, not per step.
    in_specs = [pl.BlockSpec((B, 1), lambda p, t: (0, 0))]
    inputs = [margin_pre]
    if has_mask:
        mask_f = mask.astype(jnp.float32)
        in_specs.append(pl.BlockSpec((B, tile_t), lambda p, t: (0, p * n_t + t)))
        inputs.append(mask_f)
        den = jnp.sum(mask_f)                 # cheap (B*T) reduce, done by XLA
    else:
        # mask=None: no mask stream at all -- mean == sum / (B*T) in the wrapper.
        den = jnp.float32(B * T)
    in_specs += [unit_spec, unit_spec, unit_spec]
    inputs += [pred, pos, neg]

    kernel = partial(_contrastive_kernel,
                     inv_temp=inv_temp,
                     adaptive_margin=bool(adaptive_margin),
                     has_mask=has_mask)

    partials = pl.pallas_call(
        kernel,
        out_shape=jax.ShapeDtypeStruct((n_par, 8, 128), jnp.float32),
        grid_spec=pltpu.PrefetchScalarGridSpec(
            num_scalar_prefetch=0,
            grid=(n_par, n_t),
            in_specs=in_specs,
            # (8,128)-aligned, lane-dense partial-sum slab per parallel chunk.
            out_specs=pl.BlockSpec((1, 8, 128), lambda p, t: (p, 0, 0)),
            scratch_shapes=[pltpu.VMEM((B, tile_t), jnp.float32)],
        ),
        compiler_params=pltpu.CompilerParams(
            dimension_semantics=("parallel", "arbitrary"),
            vmem_limit_bytes=int(vmem_limit),
        ),
    )(*inputs)

    num = jnp.sum(partials[:, 0, 0])
    return num / den


# --------------------------------------------------------------------------------------
# Pure-JAX reference mirroring the PyTorch forward (for the sanity check)
# --------------------------------------------------------------------------------------
def _reference_loss(pred, pos, neg, severity_factors, mask=None,
                    temperature=TEMPERATURE, adaptive_margin=True):
    def cos(a, b):
        dot = jnp.sum(a * b, axis=-1)
        na = jnp.maximum(jnp.linalg.norm(a, axis=-1), _EPS)
        nb = jnp.maximum(jnp.linalg.norm(b, axis=-1), _EPS)
        return dot / (na * nb)
    pos_sim = cos(pred, pos)
    if adaptive_margin:
        pos_sim = pos_sim - (0.1 * severity_factors)[:, None]
    neg_sim = cos(pred, neg)
    pos_sim = pos_sim / temperature
    neg_sim = neg_sim / temperature
    loss = -jnp.log(jnp.exp(pos_sim) / (jnp.exp(pos_sim) + jnp.exp(neg_sim)))
    if mask is not None:
        return (loss * mask).sum() / mask.sum()
    return loss.mean()


if __name__ == "__main__":
    key = jax.random.PRNGKey(0)
    k1, k2, k3, k4, k5, k6, k_emb = jax.random.split(key, 7)

    # --- case 1: module-sized shapes, no mask (mask-free kernel variant) ---
    B, T, D = 2, 8, 32
    predicted_soft_units = jax.random.normal(k1, (B, T, D), jnp.float32)
    positive_soft_units = jax.random.normal(k2, (B, T, D), jnp.float32)
    negative_soft_units = jax.random.normal(k3, (B, T, D), jnp.float32)
    severities = ['moderate', 'severe']

    # Deterministic init matching nn.Embedding(4, 64): computed (as in the original
    # forward) but never used by the loss value itself.
    severity_embedding_weight = jax.random.normal(k_emb, (4, 64), jnp.float32)
    severity_indices = jnp.array([SEVERITY_TO_IDX[s] for s in severities], jnp.int32)
    _severity_embeds = severity_embedding_weight[severity_indices]   # (B, 64), unused downstream

    severity_factors = jnp.array([SEVERITY_WEIGHTS[s] for s in severities], jnp.float32)

    loss = severity_contrastive_loss(predicted_soft_units, positive_soft_units,
                                     negative_soft_units, severity_factors, mask=None)
    loss = jax.block_until_ready(loss)
    ref = _reference_loss(predicted_soft_units, positive_soft_units,
                          negative_soft_units, severity_factors, mask=None)
    assert jnp.allclose(loss, ref, rtol=1e-5, atol=1e-5), (loss, ref)

    # --- case 2: longer sequence + mask (exercises 128-aligned tiling, the scratch
    # accumulator, and the 2-way parallel partial-sum outputs) ---
    B2, T2, D2 = 2, 2048, 32
    pred2 = jax.random.normal(k4, (B2, T2, D2), jnp.float32)
    pos2 = jax.random.normal(k5, (B2, T2, D2), jnp.float32)
    neg2 = jax.random.normal(k6, (B2, T2, D2), jnp.float32)
    lengths = jnp.array([T2, 1500], jnp.int32)
    mask2 = (jnp.arange(T2)[None, :] < lengths[:, None]).astype(jnp.float32)

    loss2 = severity_contrastive_loss(pred2, pos2, neg2, severity_factors, mask=mask2)
    loss2 = jax.block_until_ready(loss2)
    ref2 = _reference_loss(pred2, pos2, neg2, severity_factors, mask=mask2)
    assert jnp.allclose(loss2, ref2, rtol=1e-4, atol=1e-4), (loss2, ref2)

    print("KERNEL_OK")
</pallas_src>

<mosaic_0001>
module attributes {stable_mosaic.version = 11 : i64} {
  func.func @_contrastive_kernel(%arg0: i32, %arg1: i32, %arg2: memref<2x1xf32, #tpu.memory_space<vmem>>, %arg3: memref<2x8x32xf32, #tpu.memory_space<vmem>>, %arg4: memref<2x8x32xf32, #tpu.memory_space<vmem>>, %arg5: memref<2x8x32xf32, #tpu.memory_space<vmem>>, %arg6: memref<1x8x128xf32, #tpu.memory_space<vmem>>, %arg7: memref<2x8xf32, #tpu.memory_space<vmem>>) attributes {dimension_semantics = [#tpu.dimension_semantics<parallel>, #tpu.dimension_semantics<arbitrary>], iteration_bounds = array<i64: 1, 1>, scalar_prefetch = 0 : i64, scratch_operands = 1 : i64, tpu.core_type = #tpu.core_type<tc>, window_params = [{pipeline_mode = #tpu.pipeline_mode<synchronous>, transform_indices = @transform_0, window_bounds = array<i64: 2, 1>}, {transform_indices = @transform_1, window_bounds = array<i64: 2, 8, 32>}, {transform_indices = @transform_2, window_bounds = array<i64: 2, 8, 32>}, {transform_indices = @transform_3, window_bounds = array<i64: 2, 8, 32>}, {transform_indices = @transform_4, window_bounds = array<i64: 1, 8, 128>}]} {
    %c0_i32 = arith.constant 0 : i32
    %0 = arith.cmpi eq, %arg1, %c0_i32 : i32
    %1 = arith.extui %0 : i1 to i32
    %c0_i32_0 = arith.constant 0 : i32
    %2 = arith.cmpi ne, %1, %c0_i32_0 : i32
    scf.if %2 {
      %cst_26 = arith.constant 0.000000e+00 : f32
      %45 = vector.broadcast %cst_26 : f32 to vector<2x8xf32>
      %c0_27 = arith.constant 0 : index
      %c0_28 = arith.constant 0 : index
      %46 = vector.load %arg7[%c0_27, %c0_28] : memref<2x8xf32, #tpu.memory_space<vmem>>, vector<2x8xf32>
      tpu.vector_store %arg7[%c0_27, %c0_28], %45 {strides = array<i32>} : memref<2x8xf32, #tpu.memory_space<vmem>>, vector<2x8xf32>,
    } else {
    }
    %c0 = arith.constant 0 : index
    %c0_1 = arith.constant 0 : index
    %c0_2 = arith.constant 0 : index
    %3 = vector.load %arg3[%c0, %c0_1, %c0_2] : memref<2x8x32xf32, #tpu.memory_space<vmem>>, vector<2x8x32xf32>
    %c0_3 = arith.constant 0 : index
    %c0_4 = arith.constant 0 : index
    %c0_5 = arith.constant 0 : index
    %4 = vector.load %arg4[%c0_3, %c0_4, %c0_5] : memref<2x8x32xf32, #tpu.memory_space<vmem>>, vector<2x8x32xf32>
    %c0_6 = arith.constant 0 : index
    %c0_7 = arith.constant 0 : index
    %c0_8 = arith.constant 0 : index
    %5 = vector.load %arg5[%c0_6, %c0_7, %c0_8] : memref<2x8x32xf32, #tpu.memory_space<vmem>>, vector<2x8x32xf32>
    %6 = arith.mulf %3, %3 : vector<2x8x32xf32>
    %cst = arith.constant dense<0.000000e+00> : vector<2x8xf32>
    %7 = vector.multi_reduction <add>, %6, %cst [2] : vector<2x8x32xf32> to vector<2x8xf32>
    %cst_9 = arith.constant 1.000000e-16 : f32
    %8 = vector.broadcast %cst_9 : f32 to vector<2x8xf32>
    %9 = arith.maximumf %7, %8 : vector<2x8xf32>
    %10 = math.rsqrt %9 : vector<2x8xf32>
    %11 = arith.mulf %3, %4 : vector<2x8x32xf32>
    %cst_10 = arith.constant dense<0.000000e+00> : vector<2x8xf32>
    %12 = vector.multi_reduction <add>, %11, %cst_10 [2] : vector<2x8x32xf32> to vector<2x8xf32>
    %13 = arith.mulf %4, %4 : vector<2x8x32xf32>
    %cst_11 = arith.constant dense<0.000000e+00> : vector<2x8xf32>
    %14 = vector.multi_reduction <add>, %13, %cst_11 [2] : vector<2x8x32xf32> to vector<2x8xf32>
    %cst_12 = arith.constant 1.000000e-16 : f32
    %15 = vector.broadcast %cst_12 : f32 to vector<2x8xf32>
    %16 = arith.maximumf %14, %15 : vector<2x8xf32>
    %17 = math.rsqrt %16 : vector<2x8xf32>
    %18 = arith.mulf %12, %10 : vector<2x8xf32>
    %19 = arith.mulf %18, %17 : vector<2x8xf32>
    %20 = arith.mulf %3, %5 : vector<2x8x32xf32>
    %cst_13 = arith.constant dense<0.000000e+00> : vector<2x8xf32>
    %21 = vector.multi_reduction <add>, %20, %cst_13 [2] : vector<2x8x32xf32> to vector<2x8xf32>
    %22 = arith.mulf %5, %5 : vector<2x8x32xf32>
    %cst_14 = arith.constant dense<0.000000e+00> : vector<2x8xf32>
    %23 = vector.multi_reduction <add>, %22, %cst_14 [2] : vector<2x8x32xf32> to vector<2x8xf32>
    %cst_15 = arith.constant 1.000000e-16 : f32
    %24 = vector.broadcast %cst_15 : f32 to vector<2x8xf32>
    %25 = arith.maximumf %23, %24 : vector<2x8xf32>
    %26 = math.rsqrt %25 : vector<2x8xf32>
    %27 = arith.mulf %21, %10 : vector<2x8xf32>
    %28 = arith.mulf %27, %26 : vector<2x8xf32>
    %29 = arith.subf %28, %19 : vector<2x8xf32>
    %cst_16 = arith.constant 14.2857141 : f32
    %30 = vector.broadcast %cst_16 : f32 to vector<2x8xf32>
    %31 = arith.mulf %29, %30 : vector<2x8xf32>
    %c0_17 = arith.constant 0 : index
    %c0_18 = arith.constant 0 : index
    %32 = vector.load %arg2[%c0_17, %c0_18] : memref<2x1xf32, #tpu.memory_space<vmem>>, vector<2x1xf32>
    %33 = vector.broadcast %32 : vector<2x1xf32> to vector<2x8xf32>
    %34 = arith.addf %31, %33 : vector<2x8xf32>
    %35 = math.exp %34 : vector<2x8xf32>
    %cst_19 = arith.constant 1.000000e+00 : f32
    %36 = vector.broadcast %cst_19 : f32 to vector<2x8xf32>
    %37 = arith.addf %36, %35 : vector<2x8xf32>
    %38 = math.log %37 : vector<2x8xf32>
    %c0_20 = arith.constant 0 : index
    %c0_21 = arith.constant 0 : index
    %39 = vector.load %arg7[%c0_20, %c0_21] : memref<2x8xf32, #tpu.memory_space<vmem>>, vector<2x8xf32>
    %40 = arith.addf %39, %38 : vector<2x8xf32>
    %c0_22 = arith.constant 0 : index
    %c0_23 = arith.constant 0 : index
    %41 = vector.load %arg7[%c0_22, %c0_23] : memref<2x8xf32, #tpu.memory_space<vmem>>, vector<2x8xf32>
    tpu.vector_store %arg7[%c0_22, %c0_23], %40 {strides = array<i32>} : memref<2x8xf32, #tpu.memory_space<vmem>>, vector<2x8xf32>,
    %c0_i32_24 = arith.constant 0 : i32
    %42 = arith.cmpi eq, %arg1, %c0_i32_24 : i32
    %43 = arith.extui %42 : i1 to i32
    %c0_i32_25 = arith.constant 0 : i32
    %44 = arith.cmpi ne, %43, %c0_i32_25 : i32
    scf.if %44 {
      %c0_26 = arith.constant 0 : index
      %c0_27 = arith.constant 0 : index
      %45 = vector.load %arg7[%c0_26, %c0_27] : memref<2x8xf32, #tpu.memory_space<vmem>>, vector<2x8xf32>
      %46 = vector.shape_cast %45 : vector<2x8xf32> to vector<1x2x8xf32>
      %cst_28 = arith.constant dense<0.000000e+00> : vector<1xf32>
      %47 = vector.multi_reduction <add>, %46, %cst_28 [1, 2] : vector<1x2x8xf32> to vector<1xf32>
      %48 = vector.shape_cast %47 : vector<1xf32> to vector<1x1x1xf32>
      %49 = vector.extract %48[0, 0, 0] : f32 from vector<1x1x1xf32>
      %50 = vector.broadcast %49 : f32 to vector<1x1xf32>
      %51 = vector.shape_cast %50 : vector<1x1xf32> to vector<1x1x1xf32>
      %52 = vector.shape_cast %51 : vector<1x1x1xf32> to vector<1x1x1xf32>
      %53 = vector.broadcast %52 : vector<1x1x1xf32> to vector<1x8x128xf32>
      %c0_29 = arith.constant 0 : index
      %c0_30 = arith.constant 0 : index
      %c0_31 = arith.constant 0 : index
      %54 = vector.load %arg6[%c0_29, %c0_30, %c0_31] : memref<1x8x128xf32, #tpu.memory_space<vmem>>, vector<1x8x128xf32>
      tpu.vector_store %arg6[%c0_29, %c0_30, %c0_31], %53 {strides = array<i32>} : memref<1x8x128xf32, #tpu.memory_space<vmem>>, vector<1x8x128xf32>,
    } else {
    }
    return
  }
  func.func @transform_0(%arg0: i32, %arg1: i32) -> (i32, i32) {
    %c0_i32 = arith.constant 0 : i32
    %c0_i32_0 = arith.constant 0 : i32
    %c0_i32_1 = arith.constant 0 : i32
    return %c0_i32, %c0_i32_0 : i32, i32
  }
  func.func @transform_1(%arg0: i32, %arg1: i32) -> (i32, i32, i32) {
    %c1_i32 = arith.constant 1 : i32
    %0 = arith.muli %arg0, %c1_i32 : i32
    %1 = arith.addi %0, %arg1 : i32
    %c0_i32 = arith.constant 0 : i32
    %c0_i32_0 = arith.constant 0 : i32
    %c0_i32_1 = arith.constant 0 : i32
    return %c0_i32, %1, %c0_i32_0 : i32, i32, i32
  }
  func.func @transform_2(%arg0: i32, %arg1: i32) -> (i32, i32, i32) {
    %c1_i32 = arith.constant 1 : i32
    %0 = arith.muli %arg0, %c1_i32 : i32
    %1 = arith.addi %0, %arg1 : i32
    %c0_i32 = arith.constant 0 : i32
    %c0_i32_0 = arith.constant 0 : i32
    %c0_i32_1 = arith.constant 0 : i32
    return %c0_i32, %1, %c0_i32_0 : i32, i32, i32
  }
  func.func @transform_3(%arg0: i32, %arg1: i32) -> (i32, i32, i32) {
    %c1_i32 = arith.constant 1 : i32
    %0 = arith.muli %arg0, %c1_i32 : i32
    %1 = arith.addi %0, %arg1 : i32
    %c0_i32 = arith.constant 0 : i32
    %c0_i32_0 = arith.constant 0 : i32
    %c0_i32_1 = arith.constant 0 : i32
    return %c0_i32, %1, %c0_i32_0 : i32, i32, i32
  }
  func.func @transform_4(%arg0: i32, %arg1: i32) -> (i32, i32, i32) {
    %c0_i32 = arith.constant 0 : i32
    %c0_i32_0 = arith.constant 0 : i32
    %c0_i32_1 = arith.constant 0 : i32
    return %arg0, %c0_i32, %c0_i32_0 : i32, i32, i32
  }
}

</mosaic_0001>

<bundles_post_ra>
// kernel: tpu_custom_call.1
= control target key start
LH: loop header
LB: loop body
LE: loop exit
PB: predicated region body
PF: predicated region fallthrough
CT: control target
= control target key end

     0   :  { %9 = vsyncpa [#allocation4], 0  ;;  %s415_s0 = inlined_call_operand.vmem [shape: f32[2,1], index: 0, kind: input, shape index: {}]   ;;  %s416_s1 = inlined_call_operand.hbm [shape: f32[2,8,32], index: 1, kind: input, shape index: {}]   ;;  %s417_s2 = inlined_call_operand.hbm [shape: f32[2,8,32], index: 2, kind: input, shape index: {}]   ;;  %s418_s3 = inlined_call_operand.hbm [shape: f32[2,8,32], index: 3, kind: input, shape index: {}]   ;;  %s419_s4 = inlined_call_operand.hbm [shape: f32[1,8,128], index: 4, kind: output, shape index: {}]  }
   0x1   :  { %10 = vsyncpa [#allocation7], 0 }
   0x2   :  { %11 = vsyncpa [#allocation5], 0  ;;  %s350_s15 = smov [#allocation6]   ;;  %s351_s17 = smov [#allocation3]  }
   0x3   :  { %s37_s16 = sshll.u32 %s350_s15, 4  ;;  %s22_s18 = sshll.u32 %s351_s17, 4  ;;  %s38_s16 = int_to_ptr.vmem [resolvable:$true] %s37_s16  ;;  %s23_s18 = int_to_ptr.vmem [resolvable:$true] %s22_s18 }
   0x4   :  { %s272_s19 = scalar_lea.vmem %s38_s16, 256  ;;  %p277_p1 = scmp.lt.s32.totalorder %s38_s16, %s38_s16 }
   0x5   :  { %p273_p0 = scmp.ne.s32.totalorder %s38_s16, %s272_s19  ;;  %p278_p2 = scmp.lt.s32.totalorder %s272_s19, %s272_s19 }
   0x7   :  { %p279_p3 = por %p278_p2, %p277_p1 }
   0x9   :  { %p280_p4 = pnand %p279_p3, %p273_p0 }
   0xb   :  { %283 = shalt.err (!%p280_p4)
}
   0xc   :  { %s352_s20 = smov 128   ;;  %s353_s21 = smov 8  }
   0xd   :  { %43 = dma.hbm_to_vmem [thread:$0]  %s417_s2, 256, %s38_s16, [#allocation7], %s352_s20, %s352_s20, %s353_s21  }
   0xe   :  { %s292_s24 = scalar_lea.vmem %s23_s18, 256  ;;  %p297_p6 = scmp.lt.s32.totalorder %s23_s18, %s23_s18 }
   0xf   :  { %p293_p5 = scmp.ne.s32.totalorder %s23_s18, %s292_s24  ;;  %p298_p7 = scmp.lt.s32.totalorder %s292_s24, %s292_s24 }
  0x11   :  { %p299_p8 = por %p298_p7, %p297_p6 }
  0x13   :  { %p300_p9 = pnand %p299_p8, %p293_p5 }
  0x15   :  { %303 = shalt.err (!%p300_p9)
}
  0x16   :  { %28 = dma.hbm_to_vmem [thread:$0]  %s416_s1, 256, %s23_s18, [#allocation4], %s352_s20, %s352_s20, %s353_s21  }
  0x17   :  { %s354_s27 = smov [#allocation8]  }
  0x18   :  { %s52_s28 = sshll.u32 %s354_s27, 4  ;;  %s53_s28 = int_to_ptr.vmem [resolvable:$true] %s52_s28 }
  0x19   :  { %s312_s29 = scalar_lea.vmem %s53_s28, 256  ;;  %p317_p11 = scmp.lt.s32.totalorder %s53_s28, %s53_s28 }
  0x1a   :  { %p313_p10 = scmp.ne.s32.totalorder %s53_s28, %s312_s29  ;;  %p318_p12 = scmp.lt.s32.totalorder %s312_s29, %s312_s29 }
  0x1c   :  { %p319_p13 = por %p318_p12, %p317_p11 }
  0x1e   :  { %p320_p0 = pnand %p319_p13, %p313_p10 }
  0x20   :  { %323 = shalt.err (!%p320_p0)
}
  0x21   :  { %58 = dma.hbm_to_vmem [thread:$0]  %s418_s3, 256, %s53_s28, [#allocation7], %s352_s20, %s352_s20, %s353_s21  }
  0x22   :  { %344 = dma.done.wait [#allocation4], 256  }
  0x23   :  { %345 = vsyncadd [#allocation4], 4294967040 }
  0x24   :  { %346 = dma.done.wait [#allocation7], 512  }
  0x25   :  { %347 = vsyncadd [#allocation7], 4294966784  ;;  %v355_v0 = vmov 0   ;;  %v79_v1 = vld [vmem:[#allocation6] sm:$0xff]  ;;  %vm85_vm0 = vcmask 261120   ;;  %v77_v2 = vld [vmem:[#allocation3] sm:$0xff]  ;;  %v153_v28 = vlaneseq }
  0x26   :  { %242 = vset.pattern.permute.xlu0 %v355_v0  ;;  %243 = vset.pattern.permute.xlu1 %v355_v0  ;;  %v80_v3 = vld [vmem:[#allocation6 + $0x8] sm:$0xff]  ;;  %v104_v4 = vmul.f32 %v79_v1, %v79_v1  ;;  %v83_v5 = vmul.f32 %v77_v2, %v77_v2  ;;  %v78_v7 = vld [vmem:[#allocation3 + $0x8] sm:$0xff]  ;;  %v81_v10 = vld [vmem:[#allocation8] sm:$0xff]  ;;  %v96_v19 = vmul.f32 %v79_v1, %v77_v2  ;;  %vm75_vm1 = vcmask 58368  }
  0x27   :  { %v105_v6 = vmul.f32 %v80_v3, %v80_v3  ;;  %v84_v8 = vmul.f32 %v78_v7, %v78_v7  ;;  %v82_v9 = vld [vmem:[#allocation8 + $0x8] sm:$0xff]  ;;  %v128_v16 = vmul.f32 %v81_v10, %v81_v10  ;;  %v97_v20 = vmul.f32 %v80_v3, %v78_v7  ;;  %v148_v27 = vld [vmem:[%s415_s0] sm:$0x3]  ;;  %s357_s0 = smov [#allocation9]  }
  0x28   :  { %v106_v11 = vsel %vm85_vm0, %v104_v4, 0.0  ;;  %v86_v12 = vsel %vm85_vm0, %v83_v5, 0.0  ;;  %v129_v15 = vmul.f32 %v82_v9, %v82_v9  ;;  %v98_v21 = vsel %vm85_vm0, %v96_v19, 0.0  ;;  %s222_s5 = sshll.u32 %s357_s0, 4  ;;  %s223_s5 = int_to_ptr.vmem [resolvable:$true] %s222_s5 }
  0x29   :  { %107 = vadd.xlane.f32.xlu1 %v106_v11  ;;  %87 = vadd.xlane.f32.xlu0 %v86_v12  ;;  %v109_v13 = vsel %vm85_vm0, %v105_v6, 0.0  ;;  %v89_v14 = vsel %vm85_vm0, %v84_v8, 0.0  ;;  %v130_v18 = vsel %vm85_vm0, %v128_v16, 0.0  ;;  %v101_v22 = vsel %vm85_vm0, %v97_v20, 0.0  ;;  %s324_s7 = scalar_lea.vmem %s223_s5, 128  ;;  %p329_p2 = scmp.lt.s32.totalorder %s223_s5, %s223_s5 }
  0x2a   :  { %v133_v17 = vsel %vm85_vm0, %v129_v15, 0.0  ;;  %v120_v23 = vmul.f32 %v81_v10, %v77_v2  ;;  %v121_v24 = vmul.f32 %v82_v9, %v78_v7  ;;  %v154_v29 = vshrl.u32 %v153_v28, 7  ;;  %p325_p1 = scmp.ne.s32.totalorder %s223_s5, %s324_s7  ;;  %p330_p3 = scmp.lt.s32.totalorder %s324_s7, %s324_s7 }
  0x2b   :  { %v185_v30 = vand.u32 127, %v153_v28  ;;  %v356_v15 = vmov 0.0   ;;  %vm194_vm2 = vcmask 1041409  }
  0x2c   :  { %v122_v25 = vsel %vm85_vm0, %v120_v23, 0.0  ;;  %v125_v26 = vsel %vm85_vm0, %v121_v24, 0.0  ;;  %v159_v55 = vsub.s32 1, %v154_v29  ;;  %v155_v58 = vsub.s32 0, %v154_v29  ;;  %76 = vst.msk [vmem:[#allocation2] sm:$0x3] %vm75_vm1, %v356_v15  ;;  %p331_p4 = por %p330_p3, %p329_p2 }
  0x2d   :  { %110 = vadd.xlane.f32.xlu1 %v109_v13  ;;  %90 = vadd.xlane.f32.xlu0 %v89_v14  ;;  %v405_v31 = vsub.s32 %v185_v30, %v154_v29 }
  0x2e   :  { %p332_p5 = pnand %p331_p4, %p325_p1 }
  0x31   :  { %134 = vadd.xlane.f32.xlu1 %v133_v17  ;;  %131 = vadd.xlane.f32.xlu0 %v130_v18 }
  0x33   :  { %v175_v24 = vld [vmem:[#allocation2] sm:$0x3] }
  0x35   :  { %99 = vadd.xlane.f32.xlu0 %v98_v21  ;;  %102 = vadd.xlane.f32.xlu1 %v101_v22 }
  0x39   :  { %123 = vadd.xlane.f32.xlu0 %v122_v25  ;;  %126 = vadd.xlane.f32.xlu1 %v125_v26 }
  0x4f   :  { %151 = vperm.xlu0 %242, %v148_v27  }
  0xb2   :  { %v108_v32 = vpop.xlane.xlu1 %107  ;;  %v88_v33 = vpop.xlane.xlu0 %87 }
  0xb3   :  { %v92_v34 = vmax.f32 %v88_v33, 1e-16  ;;  %v112_v39 = vmax.f32 %v108_v32, 1e-16 }
  0xb5   :  { %244 = vrsqrt.f32 %v92_v34 }
  0xb6   :  { %v111_v35 = vpop.xlane.xlu1 %110  ;;  %v91_v36 = vpop.xlane.xlu0 %90 }
  0xb7   :  { %v113_v37 = vmax.f32 %v111_v35, 1e-16  ;;  %v93_v38 = vmax.f32 %v91_v36, 1e-16 }
  0xb9   :  { %246 = vrsqrt.f32 %v93_v38 }
  0xba   :  { %v135_v40 = vpop.xlane.xlu1 %134  ;;  %v132_v41 = vpop.xlane.xlu0 %131  ;;  %248 = vrsqrt.f32 %v113_v37 }
  0xbb   :  { %v137_v42 = vmax.f32 %v135_v40, 1e-16  ;;  %v136_v43 = vmax.f32 %v132_v41, 1e-16  ;;  %250 = vrsqrt.f32 %v112_v39 }
  0xbd   :  { %252 = vrsqrt.f32 %v137_v42 }
  0xbe   :  { %254 = vrsqrt.f32 %v136_v43  ;;  %v100_v44 = vpop.xlane.xlu0 %99  ;;  %v103_v45 = vpop.xlane.xlu1 %102 }
  0xc2   :  { %v245_v46 = vpop.eup %244  ;;  %v124_v47 = vpop.xlane.xlu0 %123 }
  0xc3   :  { %v127_v48 = vpop.xlane.xlu1 %126  ;;  %v116_v51 = vmul.f32 %v245_v46, %v100_v44  ;;  %v140_v57 = vmul.f32 %v245_v46, %v124_v47 }
  0xc6   :  { %v247_v49 = vpop.eup %246 }
  0xc7   :  { %v249_v50 = vpop.eup %248  ;;  %v117_v52 = vmul.f32 %v247_v49, %v103_v45  ;;  %v141_v54 = vmul.f32 %v247_v49, %v127_v48 }
  0xc8   :  { %v251_v53 = vpop.eup %250 }
  0xc9   :  { %v119_v61 = vmul.f32 %v249_v50, %v117_v52  ;;  %v118_v63 = vmul.f32 %v251_v53, %v116_v51 }
  0xca   :  { %v253_v56 = vpop.eup %252  ;;  %v152_v59 = vpop.permute.xlu0 %151 }
  0xcb   :  { %v255_v60 = vpop.eup %254  ;;  %v143_v62 = vmul.f32 %v253_v56, %v141_v54  ;;  %v160_v2 = vrot.slane %v152_v59, %v159_v55  ;;  %v156_v4 = vrot.slane %v152_v59, %v155_v58 }
  0xcc   :  { %v142_v0 = vmul.f32 %v255_v60, %v140_v57 }
  0xcd   :  { %v145_v1 = vsub.f32 %v143_v62, %v119_v61 }
  0xce   :  { %v144_v3 = vsub.f32 %v142_v0, %v118_v63 }
  0xcf   :  { %v147_v5 = vmul.f32 14.285714, %v145_v1 }
  0xd0   :  { %v146_v6 = vmul.f32 14.285714, %v144_v3 }
  0xd1   :  { %v164_v7 = vadd.f32 %v160_v2, %v147_v5 }
  0xd2   :  { %v163_v8 = vadd.f32 %v156_v4, %v146_v6 }
  0xd3   :  { %v167_v9 = vmul.f32 1.442695, %v164_v7 }
  0xd4   :  { %v165_v10 = vmul.f32 1.442695, %v163_v8 }
  0xd5   :  { %256 = vpow2.f32 %v167_v9 }
  0xd6   :  { %258 = vpow2.f32 %v165_v10 }
  0xe2   :  { %v257_v11 = vpop.eup %256 }
  0xe3   :  { %v259_v12 = vpop.eup %258  ;;  %v170_v14 = vadd.f32 1.0, %v257_v11 }
  0xe4   :  { %v169_v13 = vadd.f32 1.0, %v259_v12 }
  0xe6   :  { %260 = vlog2.f32 %v169_v13 }
  0xe7   :  { %262 = vlog2.f32 %v170_v14 }
  0xf3   :  { %v261_v16 = vpop.eup %260 }
  0xf4   :  { %v172_v17 = vmul.f32 0.6931472, %v261_v16  ;;  %v263_v18 = vpop.eup %262 }
  0xf5   :  { %v174_v19 = vmul.f32 0.6931472, %v263_v18 }
  0xf6   :  { %179 = vperm.xlu1 %243, %v172_v17  }
  0xfa   :  { %182 = vperm.xlu1 %243, %v174_v19  }
 0x171   :  { %v180_v20 = vpop.permute.xlu1 %179 }
 0x172   :  { %v189_v22 = vrot.slane %v180_v20, %v405_v31 }
 0x175   :  { %v183_v21 = vpop.permute.xlu1 %182 }
 0x176   :  { %v193_v23 = vrot.slane %v183_v21, %v405_v31 }
 0x178   :  { %v195_v25 = vsel %vm194_vm2, %v193_v23, %v189_v22 }
 0x179   :  { %v197_v26 = vadd.f32 %v195_v25, %v175_v24 }
 0x17b   :  { %199 = vst.msk [vmem:[#allocation2] sm:$0x3] %vm75_vm1, %v197_v26 }
 0x182   :  { %v203_v27 = vld [vmem:[#allocation2] sm:$0x3] }
 0x183   :  { %v204_v28 = vsel %vm75_vm1, %v203_v27, 0.0 }
 0x184   :  { %205 = vadd.xlane.f32.xlu1 %v204_v28 }
 0x20d   :  { %v206_v29 = vpop.xlane.xlu1 %205 }
 0x20e   :  { %v207_v30 = vrot.slane %v206_v29, 4 }
 0x210   :  { %v208_v32 = vadd.f32 %v207_v30, %v206_v29 }
 0x212   :  { %v209_v33 = vrot.slane %v208_v32, 2 }
 0x214   :  { %v210_v34 = vadd.f32 %v209_v33, %v208_v32 }
 0x216   :  { %v211_v35 = vrot.slane %v210_v34, 1 }
 0x218   :  { %v212_v36 = vadd.f32 %v211_v35, %v210_v34 }
 0x21a   :  { %232 = vpush %v212_v36 }
 0x24b   :  { %s233_s6 = spop %232 }
 0x24c   :  { %v214_v31 = vstv %s233_s6 }
 0x24d   :  { %215 = vst [vmem:[#allocation9] sm:$0xff] %v214_v31 }
 0x24e   :  { %335 = shalt.err (!%p332_p5)
}
 0x24f   :  { %225 = dma.vmem_to_hbm [thread:$0]  %s223_s5, 128, %s419_s4, [#allocation5]  }
 0x250   :  { %348 = dma.done.wait [#allocation5], 128  }
 0x251   :  { %349 = vsyncadd [#allocation5], 4294967168 }
 0x252   :  { %229 = vsyncpa [#allocation4], 1 }
 0x253   :  { %230 = vsyncpa [#allocation7], 1 }
 0x254   :  { %231 = vsyncpa [#allocation5], 1 }

</bundles_post_ra>
